<compile_context>
chip_gen: v7x
topology: tpu7x:2x2x1
jax: 0.10.0
libtpu: 0.0.40
codegen_flags: <defaults>
</compile_context>

<pallas_src>
import jax
import jax.numpy as jnp
from jax import lax
from jax.experimental import pallas as pl
from jax.experimental.pallas import tpu as pltpu

LANES = 128
SUBLANES = 8
CHUNK_ROWS = 128                        # rows per in-kernel reduction chunk
TARGET_TILE_BYTES = 4 * 1024 * 1024     # per-input per-grid-step DMA tile
VMEM_LIMIT_BYTES = 32 * 1024 * 1024     # 2 inputs x 2 bufs x 4 MiB = 16 MiB << 32 MiB
MIN_KERNEL_ELEMS_ALIGNED = 1 << 16      # below this, XLA's fused mean wins
MIN_KERNEL_ELEMS_PADDED = 1 << 20       # misaligned input needs a pad copy -> higher bar


def _round_up(x, m):
    return ((x + m - 1) // m) * m


def _make_mse_partial_kernel(row_tile, chunk_rows, rem_rows):
    """Kernel writing a per-grid-step (SUBLANES, LANES) partial sum of (p-g)^2."""
    assert row_tile % chunk_rows == 0 and chunk_rows % SUBLANES == 0
    nchunks_full = row_tile // chunk_rows
    groups = chunk_rows // SUBLANES

    def _partial(p_ref, g_ref, nchunks, valid_rows):
        # Chunked per-lane reduction: bounded live ranges (no VMEM spills) and
        # purely per-lane VPU adds (no XLU work) in the hot loop.
        def body(c, acc):
            start = pl.multiple_of(c * chunk_rows, chunk_rows)
            p = p_ref[pl.ds(start, chunk_rows), :].astype(jnp.float32)
            g = g_ref[pl.ds(start, chunk_rows), :].astype(jnp.float32)
            d = p - g
            dd = d * d
            if valid_rows is not None:
                # Ragged last block: rows past the true extent are unspecified
                # VMEM garbage; a select (not a multiply) keeps NaN/Inf out.
                row = start + lax.broadcasted_iota(jnp.int32, (chunk_rows, LANES), 0)
                dd = jnp.where(row < valid_rows, dd, 0.0)
            return acc + jnp.sum(dd.reshape(groups, SUBLANES, LANES), axis=0)

        init = jnp.zeros((SUBLANES, LANES), jnp.float32)
        return lax.fori_loop(0, nchunks, body, init, unroll=min(4, nchunks))

    def kernel(p_ref, g_ref, out_ref):
        if rem_rows == 0:
            out_ref[...] = _partial(p_ref, g_ref, nchunks_full, None)
        else:
            last = pl.num_programs(0) - 1
            nchunks_last = pl.cdiv(rem_rows, chunk_rows)

            @pl.when(pl.program_id(0) != last)
            def _():
                out_ref[...] = _partial(p_ref, g_ref, nchunks_full, None)

            @pl.when(pl.program_id(0) == last)
            def _():
                out_ref[...] = _partial(p_ref, g_ref, nchunks_last, rem_rows)

    return kernel


def _to_slab(x):
    """Flatten (free for contiguous layouts) and view as a lane-dense (rows, 128)
    slab.  Aligned sizes (n % 128 == 0) need NO pad -> pure zero-copy reshape;
    otherwise pad with at most 127 zeros (which contribute exactly 0)."""
    flat = x.reshape(-1)
    n = flat.shape[0]
    rem = n % LANES
    if rem != 0:
        # TODO(synk): this pad materializes an HBM copy unless XLA fuses it into
        # the pallas_call (allow_input_fusion below) -- verify in post-opt HLO.
        flat = jnp.pad(flat, (0, LANES - rem))
    return flat.reshape(flat.shape[0] // LANES, LANES)


def supervised_l2_loss(pc_source, pc_target, pred_flow, gt_flow, *,
                       row_tile=None, min_kernel_elements=None):
    """Pallas equivalent of SupervisedL2Loss.forward (pc_source/pc_target unused)."""
    del pc_source, pc_target  # unused, matching the PyTorch module semantics
    assert pred_flow.shape == gt_flow.shape, "pred_flow/gt_flow shape mismatch"

    out_dtype = jnp.result_type(pred_flow.dtype, gt_flow.dtype)
    n = pred_flow.size
    aligned = (n % LANES) == 0

    if min_kernel_elements is None:
        min_kernel_elements = (MIN_KERNEL_ELEMS_ALIGNED if aligned
                               else MIN_KERNEL_ELEMS_PADDED)
    if n == 0 or n < min_kernel_elements:
        # Tiny (or pad-requiring) inputs: XLA's fused mean is bandwidth-optimal.
        d = pred_flow.astype(jnp.float32) - gt_flow.astype(jnp.float32)
        return jnp.mean(jnp.square(d)).astype(out_dtype)

    p_slab = _to_slab(pred_flow)
    g_slab = _to_slab(gt_flow)
    rows = p_slab.shape[0]

    # Tile sizing by bytes so per-step DMA time (and the ~0.35us per-step
    # overhead fraction) stays constant across dtypes and generations.
    itemsize = max(p_slab.dtype.itemsize, g_slab.dtype.itemsize)
    if row_tile is None:
        row_tile = TARGET_TILE_BYTES // (LANES * itemsize)
    row_tile = min(int(row_tile), _round_up(rows, SUBLANES))
    row_tile = max(SUBLANES, (row_tile // SUBLANES) * SUBLANES)
    chunk_rows = min(CHUNK_ROWS, row_tile)
    row_tile = (row_tile // chunk_rows) * chunk_rows

    num_blocks = pl.cdiv(rows, row_tile)
    rem_rows = rows % row_tile          # valid rows in the last (ragged) block
    out_rows = num_blocks * SUBLANES

    flops = 3 * rows * LANES
    bytes_accessed = (p_slab.size * p_slab.dtype.itemsize
                      + g_slab.size * g_slab.dtype.itemsize
                      + out_rows * LANES * 4)

    partials = pl.pallas_call(
        _make_mse_partial_kernel(row_tile, chunk_rows, rem_rows),
        out_shape=jax.ShapeDtypeStruct((out_rows, LANES), jnp.float32),
        grid_spec=pltpu.PrefetchScalarGridSpec(
            num_scalar_prefetch=0,
            grid=(num_blocks,),
            in_specs=[
                pl.BlockSpec((row_tile, LANES), lambda i: (i, 0)),
                pl.BlockSpec((row_tile, LANES), lambda i: (i, 0)),
            ],
            out_specs=pl.BlockSpec((SUBLANES, LANES), lambda i: (i, 0)),
        ),
        compiler_params=pltpu.CompilerParams(
            # No carried state across grid steps -> safe to shard across cores.
            # TODO(synk): on v7x, check xprof that both TCs are active; if not,
            # try pltpu.CORE_PARALLEL (measure, don't assume).
            dimension_semantics=("parallel",),
            vmem_limit_bytes=VMEM_LIMIT_BYTES,
            allow_input_fusion=[True, True],
        ),
        cost_estimate=pl.CostEstimate(
            flops=flops, transcendentals=0, bytes_accessed=bytes_accessed),
    )(p_slab, g_slab)

    # Tiny epilogue: cross-lane reduce of per-block partials + mean divide.
    return (jnp.sum(partials) / jnp.float32(n)).astype(out_dtype)


if __name__ == "__main__":
    def ref_loss(p, g):
        return jnp.mean(jnp.square(p.astype(jnp.float32) - g.astype(jnp.float32)))

    checks = []  # (got, want, rtol)

    # Module-typical small point-cloud flows: [B, N, 3].
    k = jax.random.split(jax.random.PRNGKey(0), 4)
    B, N = 2, 128
    pc_source = jax.random.normal(k[0], (B, N, 3), jnp.float32)
    pc_target = jax.random.normal(k[1], (B, N, 3), jnp.float32)
    pred_flow = jax.random.normal(k[2], (B, N, 3), jnp.float32)
    gt_flow = jax.random.normal(k[3], (B, N, 3), jnp.float32)

    # 1) Default path (tiny input -> XLA short-circuit).
    checks.append((supervised_l2_loss(pc_source, pc_target, pred_flow, gt_flow),
                   ref_loss(pred_flow, gt_flow), 1e-5))

    # 2) Force the Pallas kernel: n % 128 == 0 -> zero-copy slab, single block.
    checks.append((supervised_l2_loss(pc_source, pc_target, pred_flow, gt_flow,
                                      min_kernel_elements=0),
                   ref_loss(pred_flow, gt_flow), 1e-5))

    # 3) Misaligned n (66000) -> minimal pad path; multi-block + ragged tail.
    k2 = jax.random.split(jax.random.PRNGKey(1), 2)
    pred3 = jax.random.normal(k2[0], (2, 11000, 3), jnp.float32)
    gt3 = jax.random.normal(k2[1], (2, 11000, 3), jnp.float32)
    checks.append((supervised_l2_loss(pc_source, pc_target, pred3, gt3,
                                      row_tile=64, min_kernel_elements=0),
                   ref_loss(pred3, gt3), 1e-5))

    # 4) bf16 inputs (dtype-aware tile sizing, f32 accumulation).
    predb, gtb = pred3.astype(jnp.bfloat16), gt3.astype(jnp.bfloat16)
    checks.append((supervised_l2_loss(pc_source, pc_target, predb, gtb,
                                      min_kernel_elements=0),
                   ref_loss(predb, gtb), 1e-2))

    # 5) Aligned multi-block (no pad at all) with an explicit small row tile.
    k3 = jax.random.split(jax.random.PRNGKey(2), 2)
    pred5 = jax.random.normal(k3[0], (2, 65536, 3), jnp.float32)  # n % 128 == 0
    gt5 = jax.random.normal(k3[1], (2, 65536, 3), jnp.float32)
    checks.append((supervised_l2_loss(pc_source, pc_target, pred5, gt5,
                                      row_tile=512, min_kernel_elements=0),
                   ref_loss(pred5, gt5), 1e-5))

    for got, want, rtol in checks:
        got = jax.block_until_ready(got)
        assert got.shape == (), got.shape
        assert jnp.allclose(got, want, rtol=rtol, atol=1e-6), (got, want)

    print("KERNEL_OK")
</pallas_src>

<mosaic_0001>
module attributes {stable_mosaic.version = 11 : i64} {
  func.func @kernel(%arg0: i32, %arg1: memref<8x128xf32, #tpu.memory_space<vmem>>, %arg2: memref<8x128xf32, #tpu.memory_space<vmem>>, %arg3: memref<8x128xf32, #tpu.memory_space<vmem>>) attributes {dimension_semantics = [#tpu.dimension_semantics<parallel>], iteration_bounds = array<i64: 1>, scalar_prefetch = 0 : i64, scratch_operands = 0 : i64, tpu.core_type = #tpu.core_type<tc>, window_params = [{transform_indices = @transform_0, window_bounds = array<i64: 8, 128>}, {transform_indices = @transform_1, window_bounds = array<i64: 8, 128>}, {transform_indices = @transform_2, window_bounds = array<i64: 8, 128>}]} {
    %c0_i32 = arith.constant 0 : i32
    %0 = arith.cmpi ne, %arg0, %c0_i32 : i32
    %1 = arith.extui %0 : i1 to i32
    %c0_i32_0 = arith.constant 0 : i32
    %2 = arith.cmpi ne, %1, %c0_i32_0 : i32
    scf.if %2 {
      %cst = arith.constant 0.000000e+00 : f32
      %6 = vector.broadcast %cst : f32 to vector<8x128xf32>
      %c0_i32_3 = arith.constant 0 : i32
      %c8_i32 = arith.constant 8 : i32
      %7 = arith.muli %c0_i32_3, %c8_i32 : i32
      %8 = tpu.assume_multiple %7, 8 : i32
      %9 = arith.index_cast %8 : i32 to index
      %c0 = arith.constant 0 : index
      %10 = vector.load %arg1[%9, %c0] : memref<8x128xf32, #tpu.memory_space<vmem>>, vector<8x128xf32>
      %11 = arith.index_cast %8 : i32 to index
      %c0_4 = arith.constant 0 : index
      %12 = vector.load %arg2[%11, %c0_4] : memref<8x128xf32, #tpu.memory_space<vmem>>, vector<8x128xf32>
      %13 = arith.subf %10, %12 : vector<8x128xf32>
      %14 = arith.mulf %13, %13 : vector<8x128xf32>
      %15 = vector.shape_cast %14 : vector<8x128xf32> to vector<1x8x128xf32>
      %cst_5 = arith.constant dense<0.000000e+00> : vector<8x128xf32>
      %16 = vector.multi_reduction <add>, %15, %cst_5 [0] : vector<1x8x128xf32> to vector<8x128xf32>
      %17 = arith.addf %6, %16 : vector<8x128xf32>
      %c1_i32 = arith.constant 1 : i32
      %c0_6 = arith.constant 0 : index
      %c0_7 = arith.constant 0 : index
      %18 = vector.load %arg3[%c0_6, %c0_7] : memref<8x128xf32, #tpu.memory_space<vmem>>, vector<8x128xf32>
      tpu.vector_store %arg3[%c0_6, %c0_7], %17 {strides = array<i32>} : memref<8x128xf32, #tpu.memory_space<vmem>>, vector<8x128xf32>,
    } else {
    }
    %c0_i32_1 = arith.constant 0 : i32
    %3 = arith.cmpi eq, %arg0, %c0_i32_1 : i32
    %4 = arith.extui %3 : i1 to i32
    %c0_i32_2 = arith.constant 0 : i32
    %5 = arith.cmpi ne, %4, %c0_i32_2 : i32
    scf.if %5 {
      %cst = arith.constant 0.000000e+00 : f32
      %6 = vector.broadcast %cst : f32 to vector<8x128xf32>
      %c0_i32_3 = arith.constant 0 : i32
      %c8_i32 = arith.constant 8 : i32
      %7 = arith.muli %c0_i32_3, %c8_i32 : i32
      %8 = tpu.assume_multiple %7, 8 : i32
      %9 = arith.index_cast %8 : i32 to index
      %c0 = arith.constant 0 : index
      %10 = vector.load %arg1[%9, %c0] : memref<8x128xf32, #tpu.memory_space<vmem>>, vector<8x128xf32>
      %11 = arith.index_cast %8 : i32 to index
      %c0_4 = arith.constant 0 : index
      %12 = vector.load %arg2[%11, %c0_4] : memref<8x128xf32, #tpu.memory_space<vmem>>, vector<8x128xf32>
      %13 = arith.subf %10, %12 : vector<8x128xf32>
      %14 = arith.mulf %13, %13 : vector<8x128xf32>
      %15 = tpu.iota {dimensions = array<i32: 0>} : vector<8x128xi32>
      %16 = vector.broadcast %8 : i32 to vector<8x128xi32>
      %17 = arith.addi %16, %15 : vector<8x128xi32>
      %c6_i32 = arith.constant 6 : i32
      %18 = vector.broadcast %c6_i32 : i32 to vector<8x128xi32>
      %19 = arith.cmpi slt, %17, %18 : vector<8x128xi32>
      %cst_5 = arith.constant 0.000000e+00 : f32
      %20 = vector.broadcast %cst_5 : f32 to vector<8x128xf32>
      %21 = arith.select %19, %14, %20 : vector<8x128xi1>, vector<8x128xf32>
      %22 = vector.shape_cast %21 : vector<8x128xf32> to vector<1x8x128xf32>
      %cst_6 = arith.constant dense<0.000000e+00> : vector<8x128xf32>
      %23 = vector.multi_reduction <add>, %22, %cst_6 [0] : vector<1x8x128xf32> to vector<8x128xf32>
      %24 = arith.addf %6, %23 : vector<8x128xf32>
      %c1_i32 = arith.constant 1 : i32
      %c0_7 = arith.constant 0 : index
      %c0_8 = arith.constant 0 : index
      %25 = vector.load %arg3[%c0_7, %c0_8] : memref<8x128xf32, #tpu.memory_space<vmem>>, vector<8x128xf32>
      tpu.vector_store %arg3[%c0_7, %c0_8], %24 {strides = array<i32>} : memref<8x128xf32, #tpu.memory_space<vmem>>, vector<8x128xf32>,
    } else {
    }
    return
  }
  func.func @transform_0(%arg0: i32) -> (i32, i32) {
    %c0_i32 = arith.constant 0 : i32
    %c0_i32_0 = arith.constant 0 : i32
    return %arg0, %c0_i32 : i32, i32
  }
  func.func @transform_1(%arg0: i32) -> (i32, i32) {
    %c0_i32 = arith.constant 0 : i32
    %c0_i32_0 = arith.constant 0 : i32
    return %arg0, %c0_i32 : i32, i32
  }
  func.func @transform_2(%arg0: i32) -> (i32, i32) {
    %c0_i32 = arith.constant 0 : i32
    %c0_i32_0 = arith.constant 0 : i32
    return %arg0, %c0_i32 : i32, i32
  }
}

</mosaic_0001>

<bundles_post_ra>
// kernel: tpu_custom_call.1
= control target key start
LH: loop header
LB: loop body
LE: loop exit
PB: predicated region body
PF: predicated region fallthrough
CT: control target
= control target key end

     0   :  { %7 = vsyncpa [#allocation3], 0  ;;  %s209_s0 = inlined_call_operand.hbm [shape: f32[6,128], index: 0, kind: input, shape index: {}]   ;;  %s210_s1 = inlined_call_operand.hbm [shape: f32[6,128], index: 1, kind: input, shape index: {}]   ;;  %s211_s2 = inlined_call_operand.hbm [shape: f32[8,128], index: 2, kind: output, shape index: {}]  }
   0x1   :  { %8 = vsyncpa [#allocation6], 0 }
   0x2   :  { %9 = vsyncpa [#allocation4], 0  ;;  %s155_s9 = smov [#allocation2]   ;;  %s156_s11 = smov [#allocation5]  }
   0x3   :  { %s16_s10 = sshll.u32 %s155_s9, 4  ;;  %s26_s12 = sshll.u32 %s156_s11, 4  ;;  %s17_s10 = int_to_ptr.vmem [resolvable:$true] %s16_s10  ;;  %s27_s12 = int_to_ptr.vmem [resolvable:$true] %s26_s12 }
   0x4   :  { %s83_s15 = scalar_lea.hbm %s209_s0, 128 }
   0x5   :  { %p84_p0 = scmp.ne.s32.totalorder %s209_s0, %s83_s15  ;;  %p87_p1 = scmp.lt.u32.totalorder %s83_s15, %s209_s0 }
   0x7   :  { %p89_p2 = pnand %p87_p1, %p84_p0 }
   0x9   :  { %92 = shalt.err (!%p89_p2)
}
   0xa   :  { %s93_s20 = scalar_lea.vmem %s17_s10, 128  ;;  %p98_p4 = scmp.lt.s32.totalorder %s17_s10, %s17_s10 }
   0xb   :  { %p94_p3 = scmp.ne.s32.totalorder %s17_s10, %s93_s20  ;;  %p99_p5 = scmp.lt.s32.totalorder %s93_s20, %s93_s20 }
   0xd   :  { %p100_p6 = por %p99_p5, %p98_p4 }
   0xf   :  { %p101_p7 = pnand %p100_p6, %p94_p3 }
  0x11   :  { %104 = shalt.err (!%p101_p7)
}
  0x12   :  { %19 = dma.hbm_to_vmem [thread:$0]  %s209_s0, 128, %s17_s10, [#allocation3]  }
  0x13   :  { %s105_s25 = scalar_lea.hbm %s210_s1, 128 }
  0x14   :  { %p106_p8 = scmp.ne.s32.totalorder %s210_s1, %s105_s25  ;;  %p109_p9 = scmp.lt.u32.totalorder %s105_s25, %s210_s1 }
  0x16   :  { %p111_p10 = pnand %p109_p9, %p106_p8 }
  0x18   :  { %114 = shalt.err (!%p111_p10)
}
  0x19   :  { %s115_s30 = scalar_lea.vmem %s27_s12, 128  ;;  %p120_p12 = scmp.lt.s32.totalorder %s27_s12, %s27_s12 }
  0x1a   :  { %p116_p11 = scmp.ne.s32.totalorder %s27_s12, %s115_s30  ;;  %p121_p13 = scmp.lt.s32.totalorder %s115_s30, %s115_s30 }
  0x1c   :  { %p122_p0 = por %p121_p13, %p120_p12 }
  0x1e   :  { %p123_p1 = pnand %p122_p0, %p116_p11 }
  0x20   :  { %126 = shalt.err (!%p123_p1)
}
  0x21   :  { %29 = dma.hbm_to_vmem [thread:$0]  %s210_s1, 128, %s27_s12, [#allocation6]  }
  0x22   :  { %149 = dma.done.wait [#allocation3], 128  }
  0x23   :  { %150 = vsyncadd [#allocation3], 4294967168 }
  0x24   :  { %151 = dma.done.wait [#allocation6], 128  }
  0x25   :  { %152 = vsyncadd [#allocation6], 4294967168  ;;  %v55_v0 = vlaneseq  ;;  %v51_v2 = vld [vmem:[#allocation2] sm:$0xff]  ;;  %v52_v3 = vld [vmem:[#allocation5] sm:$0xff]  ;;  %s157_s4 = smov [#allocation7]  }
  0x26   :  { %v53_v4 = vsub.f32 %v51_v2, %v52_v3  ;;  %s70_s5 = sshll.u32 %s157_s4, 4  ;;  %s71_s5 = int_to_ptr.vmem [resolvable:$true] %s70_s5 }
  0x27   :  { %v56_v1 = vshrl.u32 %v55_v0, 7  ;;  %s127_s6 = scalar_lea.vmem %s71_s5, 128  ;;  %p132_p3 = scmp.lt.s32.totalorder %s71_s5, %s71_s5 }
  0x28   :  { %v54_v5 = vmul.f32 %v53_v4, %v53_v4  ;;  %p128_p2 = scmp.ne.s32.totalorder %s71_s5, %s127_s6  ;;  %p133_p4 = scmp.lt.s32.totalorder %s127_s6, %s127_s6 }
  0x29   :  { %vm59_vm0 = vcmp.lt.s32.totalorder %v56_v1, 6 }
  0x2a   :  { %v60_v6 = vsel %vm59_vm0, %v54_v5, 0.0  ;;  %p134_p5 = por %p133_p4, %p132_p3 }
  0x2b   :  { %63 = vst [vmem:[#allocation7] sm:$0xff] %v60_v6 }
  0x2c   :  { %p135_p6 = pnand %p134_p5, %p128_p2 }
  0x2e   :  { %138 = shalt.err (!%p135_p6)
}
  0x2f   :  { %s139_s8 = scalar_lea.hbm %s211_s2, 128 }
  0x30   :  { %p140_p7 = scmp.ne.s32.totalorder %s211_s2, %s139_s8  ;;  %p143_p8 = scmp.lt.u32.totalorder %s139_s8, %s211_s2 }
  0x32   :  { %p145_p9 = pnand %p143_p8, %p140_p7 }
  0x34   :  { %148 = shalt.err (!%p145_p9)
}
  0x35   :  { %73 = dma.vmem_to_hbm [thread:$0]  %s71_s5, 128, %s211_s2, [#allocation4]  }
  0x36   :  { %153 = dma.done.wait [#allocation4], 128  }
  0x37   :  { %154 = vsyncadd [#allocation4], 4294967168 }
  0x38   :  { %77 = vsyncpa [#allocation3], 1 }
  0x39   :  { %78 = vsyncpa [#allocation6], 1 }
  0x3a   :  { %79 = vsyncpa [#allocation4], 1 }

</bundles_post_ra>
